<compile_context>
chip_gen: v7x
topology: tpu7x:2x2x1
jax: 0.10.0
libtpu: 0.0.40
codegen_flags: <defaults>
</compile_context>

<pallas_src>
import jax
import jax.numpy as jnp
from jax import lax
from jax.experimental import pallas as pl
from jax.experimental.pallas import tpu as pltpu

ZERO_NONZERO_PENALTY = 25.0
LANES = 128
_DEFAULT_BLOCK_BYTES = 2 * 1024 * 1024  # target HBM->VMEM bytes per input block


def _round_up(x, m):
    return -(-x // m) * m


def _round_down(x, m):
    return (x // m) * m


def _make_kernel(tile, cols, grid_len, valid_last):
    """Build the per-block kernel. All arguments are static Python ints.

    tile       : rows per block (multiple of 8, unless grid_len == 1 where it
                 equals the full row count).
    valid_last : number of valid rows in the LAST block (== tile when no
                 block is partial).
    """
    n_full = tile // 8            # full 8-row strips per block
    rem = tile % 8                # only nonzero in the single-block case
    assert rem == 0 or grid_len == 1
    unroll = max(1, min(n_full, 8))

    def strip_sum(a_ref, b_ref, row_limit):
        # row_limit: None -> every row valid; static int -> mask rows >= limit
        # (applied to diff BEFORE summation, so over-read garbage cannot
        #  inject inf/NaN).
        def strip(i, acc):
            r0 = pl.multiple_of(i * 8, 8)
            a = a_ref[pl.ds(r0, 8), :].astype(jnp.float32)
            b = b_ref[pl.ds(r0, 8), :].astype(jnp.float32)
            d = jnp.abs(jnp.exp(-4.0 * a) - jnp.exp(-4.0 * b))
            if row_limit is not None:
                rows = r0 + lax.broadcasted_iota(jnp.int32, (8, cols), 0)
                d = jnp.where(rows < row_limit, d, 0.0)
            return acc + d

        acc = jnp.zeros((8, cols), jnp.float32)
        if n_full > 0:
            acc = lax.fori_loop(0, n_full, strip, acc, unroll=unroll)
        if rem:
            # Tiny single-block tail (< 8 leftover rows); fully valid rows.
            a = a_ref[pl.ds(n_full * 8, rem), :].astype(jnp.float32)
            b = b_ref[pl.ds(n_full * 8, rem), :].astype(jnp.float32)
            d = jnp.abs(jnp.exp(-4.0 * a) - jnp.exp(-4.0 * b))
            d = jnp.concatenate(
                [d, jnp.zeros((8 - rem, cols), jnp.float32)], axis=0)
            acc = acc + d
        return acc

    def kernel(a_ref, b_ref, o_ref):
        if valid_last == tile:
            # No partial block anywhere: fully branch-free.
            o_ref[...] = strip_sum(a_ref, b_ref, None)
        else:
            pid = pl.program_id(0)

            @pl.when(pid != grid_len - 1)
            def _():
                o_ref[...] = strip_sum(a_ref, b_ref, None)

            @pl.when(pid == grid_len - 1)
            def _():
                o_ref[...] = strip_sum(a_ref, b_ref, valid_last)

    return kernel


def xor_loss(pred_ids, pred_amounts, ids=None, amounts=None, *,
             block_bytes=_DEFAULT_BLOCK_BYTES):
    """Pallas XORLoss.forward. Returns a scalar f32.

    `ids` / `amounts` do not affect the result (matches the PyTorch module).
    Inputs are streamed in their native dtype (pass bf16 for 2x less HBM
    traffic on this bandwidth-bound kernel); the math is done in f32.
    """
    assert pred_ids.shape == pred_amounts.shape
    n_elems = pred_ids.size
    assert n_elems > 0
    itemsize = jnp.dtype(pred_ids.dtype).itemsize

    # ---- streaming view: always a FREE contiguous reshape (no jnp.pad copy) -
    if n_elems % LANES == 0:
        cols = LANES                       # lane-dense 128-wide view
        rows = n_elems // LANES
    else:
        cols = pred_ids.shape[-1] if pred_ids.ndim > 1 else n_elems
        rows = n_elems // cols             # exact (cols divides n_elems)
    a = pred_ids.reshape(rows, cols)
    b = pred_amounts.reshape(rows, cols)

    # ---- tile selection: ~block_bytes per input block, rows multiple of 8 ---
    bytes_per_row = cols * itemsize
    rows_target = max(8, _round_down(max(block_bytes // bytes_per_row, 8), 8))
    if rows <= rows_target:
        tile, grid_len = rows, 1
        # v7x megacore: split mid-sized single blocks so both TCs get work.
        if rows >= 16 and rows * bytes_per_row > (512 * 1024):
            tile = _round_up(-(-rows // 2), 8)
            grid_len = -(-rows // tile)
    else:
        tile = rows_target
        grid_len = -(-rows // tile)
    valid_last = rows - (grid_len - 1) * tile     # rows valid in last block

    kernel = _make_kernel(tile, cols, grid_len, valid_last)

    # Explicit VMEM budget: 2 inputs x 2 pipeline buffers x block + headroom.
    block_in_bytes = tile * cols * itemsize
    vmem_limit = int(min(max(4 * block_in_bytes + (4 << 20), 16 << 20),
                         48 << 20))

    partials = pl.pallas_call(
        kernel,
        out_shape=jax.ShapeDtypeStruct((grid_len, 8, cols), jnp.float32),
        grid_spec=pltpu.PrefetchScalarGridSpec(
            num_scalar_prefetch=0,
            grid=(grid_len,),
            in_specs=[
                pl.BlockSpec((tile, cols), lambda i: (i, 0)),
                pl.BlockSpec((tile, cols), lambda i: (i, 0)),
            ],
            # Each block writes its own (8, cols) partial-sum slab: no resident
            # accumulator, parallel-safe grid, lane-dense stores when cols=128.
            out_specs=pl.BlockSpec((None, 8, cols), lambda i: (i, 0, 0)),
        ),
        compiler_params=pltpu.CompilerParams(
            dimension_semantics=("parallel",),
            vmem_limit_bytes=vmem_limit,
        ),
        cost_estimate=pl.CostEstimate(
            flops=6 * n_elems,
            transcendentals=2 * n_elems,
            bytes_accessed=2 * n_elems * itemsize + grid_len * 8 * cols * 4,
        ),
    )(a, b)

    # Tiny final reduction + mean + penalty outside the kernel.
    total = jnp.sum(partials, dtype=jnp.float32)
    return (total / jnp.float32(n_elems)) * jnp.float32(ZERO_NONZERO_PENALTY)


def _ref_loss(p1, p2):
    p1 = p1.astype(jnp.float32)
    p2 = p2.astype(jnp.float32)
    return jnp.mean(jnp.abs(jnp.exp(-4.0 * p1) - jnp.exp(-4.0 * p2))) \
        * ZERO_NONZERO_PENALTY


if __name__ == "__main__":
    key = jax.random.PRNGKey(0)
    k1, k2, k3, k4 = jax.random.split(key, 4)

    def check(p1, p2, extra=None, **kw):
        loss = jax.block_until_ready(xor_loss(p1, p2, *(extra or ()), **kw))
        ref = _ref_loss(p1, p2)
        assert jnp.allclose(loss, ref, rtol=1e-4, atol=1e-5), (loss, ref)

    # 1) Small (batch=8, hidden=128) f32 prediction tensors (main example);
    #    unused ids/amounts passed for API fidelity.
    shape = (8, 128)
    pred_ids = jax.random.normal(k1, shape, dtype=jnp.float32)
    pred_amounts = jax.random.normal(k2, shape, dtype=jnp.float32)
    ids = jax.random.normal(k3, shape, dtype=jnp.float32)       # unused
    amounts = jax.random.normal(k4, shape, dtype=jnp.float32)   # unused
    check(pred_ids, pred_amounts, extra=(ids, amounts))

    # 2) Ragged size (2100 elems, not a multiple of 128): natural-view path,
    #    NO wrapper pad, in-kernel tail handling.
    p1 = jax.random.normal(k3, (3, 700), dtype=jnp.float32)
    p2 = jax.random.normal(k4, (3, 700), dtype=jnp.float32)
    check(p1, p2)

    # 3) Single block whose row count is not a multiple of 8 (rem path).
    p1 = jax.random.normal(k1, (10, 128), dtype=jnp.float32)
    p2 = jax.random.normal(k2, (10, 128), dtype=jnp.float32)
    check(p1, p2)

    # 4) Multi-block parallel grid with a masked partial last block
    #    (block_bytes shrunk to force 13 blocks, last block 4/8 rows valid).
    p1 = jax.random.normal(k1, (50, 256), dtype=jnp.float32)
    p2 = jax.random.normal(k2, (50, 256), dtype=jnp.float32)
    check(p1, p2, block_bytes=8 * 128 * 4)

    # 5) Native bf16 streaming (HBM traffic halved; f32 math inside).
    check(pred_ids.astype(jnp.bfloat16), pred_amounts.astype(jnp.bfloat16))

    # 6) Mid-sized single-block input -> even split across 2 blocks
    #    (v7x megacore path) with a masked last block.
    p1 = jax.random.normal(k3, (1030, 128), dtype=jnp.float32)
    p2 = jax.random.normal(k4, (1030, 128), dtype=jnp.float32)
    check(p1, p2)

    print("KERNEL_OK")
</pallas_src>

<mosaic_0001>
module attributes {stable_mosaic.version = 11 : i64} {
  func.func @kernel(%arg0: i32, %arg1: memref<8x128xf32, #tpu.memory_space<vmem>>, %arg2: memref<8x128xf32, #tpu.memory_space<vmem>>, %arg3: memref<1x8x128xf32, #tpu.memory_space<vmem>>) attributes {dimension_semantics = [#tpu.dimension_semantics<parallel>], iteration_bounds = array<i64: 1>, scalar_prefetch = 0 : i64, scratch_operands = 0 : i64, tpu.core_type = #tpu.core_type<tc>, window_params = [{transform_indices = @transform_0, window_bounds = array<i64: 8, 128>}, {transform_indices = @transform_1, window_bounds = array<i64: 8, 128>}, {transform_indices = @transform_2, window_bounds = array<i64: 1, 8, 128>}]} {
    %cst = arith.constant 0.000000e+00 : f32
    %0 = vector.broadcast %cst : f32 to vector<8x128xf32>
    %c0_i32 = arith.constant 0 : i32
    %c8_i32 = arith.constant 8 : i32
    %1 = arith.muli %c0_i32, %c8_i32 : i32
    %2 = tpu.assume_multiple %1, 8 : i32
    %3 = arith.index_cast %2 : i32 to index
    %c0 = arith.constant 0 : index
    %4 = vector.load %arg1[%3, %c0] : memref<8x128xf32, #tpu.memory_space<vmem>>, vector<8x128xf32>
    %5 = arith.index_cast %2 : i32 to index
    %c0_0 = arith.constant 0 : index
    %6 = vector.load %arg2[%5, %c0_0] : memref<8x128xf32, #tpu.memory_space<vmem>>, vector<8x128xf32>
    %cst_1 = arith.constant -4.000000e+00 : f32
    %7 = vector.broadcast %cst_1 : f32 to vector<8x128xf32>
    %8 = arith.mulf %7, %4 : vector<8x128xf32>
    %9 = math.exp %8 : vector<8x128xf32>
    %cst_2 = arith.constant -4.000000e+00 : f32
    %10 = vector.broadcast %cst_2 : f32 to vector<8x128xf32>
    %11 = arith.mulf %10, %6 : vector<8x128xf32>
    %12 = math.exp %11 : vector<8x128xf32>
    %13 = arith.subf %9, %12 : vector<8x128xf32>
    %14 = math.absf %13 : vector<8x128xf32>
    %15 = arith.addf %0, %14 : vector<8x128xf32>
    %c1_i32 = arith.constant 1 : i32
    %c0_3 = arith.constant 0 : index
    %c0_4 = arith.constant 0 : index
    %c0_5 = arith.constant 0 : index
    %16 = vector.load %arg3[%c0_3, %c0_4, %c0_5] : memref<1x8x128xf32, #tpu.memory_space<vmem>>, vector<1x8x128xf32>
    %17 = vector.shape_cast %16 : vector<1x8x128xf32> to vector<8x128xf32>
    %18 = vector.shape_cast %15 : vector<8x128xf32> to vector<1x8x128xf32>
    tpu.vector_store %arg3[%c0_3, %c0_4, %c0_5], %18 {strides = array<i32>} : memref<1x8x128xf32, #tpu.memory_space<vmem>>, vector<1x8x128xf32>,
    return
  }
  func.func @transform_0(%arg0: i32) -> (i32, i32) {
    %c0_i32 = arith.constant 0 : i32
    %c0_i32_0 = arith.constant 0 : i32
    return %arg0, %c0_i32 : i32, i32
  }
  func.func @transform_1(%arg0: i32) -> (i32, i32) {
    %c0_i32 = arith.constant 0 : i32
    %c0_i32_0 = arith.constant 0 : i32
    return %arg0, %c0_i32 : i32, i32
  }
  func.func @transform_2(%arg0: i32) -> (i32, i32, i32) {
    %c0_i32 = arith.constant 0 : i32
    %c0_i32_0 = arith.constant 0 : i32
    %c0_i32_1 = arith.constant 0 : i32
    return %arg0, %c0_i32, %c0_i32_0 : i32, i32, i32
  }
}

</mosaic_0001>

<bundles_post_ra>
// kernel: tpu_custom_call.1
= control target key start
LH: loop header
LB: loop body
LE: loop exit
PB: predicated region body
PF: predicated region fallthrough
CT: control target
= control target key end

     0   :  { %7 = vsyncpa [#allocation3], 0  ;;  %s197_s0 = inlined_call_operand.hbm [shape: f32[8,128], index: 0, kind: input, shape index: {}]   ;;  %s198_s1 = inlined_call_operand.hbm [shape: f32[8,128], index: 1, kind: input, shape index: {}]   ;;  %s199_s2 = inlined_call_operand.hbm [shape: f32[1,8,128], index: 2, kind: output, shape index: {}]  }
   0x1   :  { %8 = vsyncpa [#allocation6], 0 }
   0x2   :  { %9 = vsyncpa [#allocation4], 0  ;;  %s143_s9 = smov [#allocation2]   ;;  %s144_s11 = smov [#allocation5]  }
   0x3   :  { %s16_s10 = sshll.u32 %s143_s9, 4  ;;  %s26_s12 = sshll.u32 %s144_s11, 4  ;;  %s17_s10 = int_to_ptr.vmem [resolvable:$true] %s16_s10  ;;  %s27_s12 = int_to_ptr.vmem [resolvable:$true] %s26_s12 }
   0x4   :  { %s71_s15 = scalar_lea.hbm %s197_s0, 128 }
   0x5   :  { %p72_p0 = scmp.ne.s32.totalorder %s197_s0, %s71_s15  ;;  %p75_p1 = scmp.lt.u32.totalorder %s71_s15, %s197_s0 }
   0x7   :  { %p77_p2 = pnand %p75_p1, %p72_p0 }
   0x9   :  { %80 = shalt.err (!%p77_p2)
}
   0xa   :  { %s81_s20 = scalar_lea.vmem %s17_s10, 128  ;;  %p86_p4 = scmp.lt.s32.totalorder %s17_s10, %s17_s10 }
   0xb   :  { %p82_p3 = scmp.ne.s32.totalorder %s17_s10, %s81_s20  ;;  %p87_p5 = scmp.lt.s32.totalorder %s81_s20, %s81_s20 }
   0xd   :  { %p88_p6 = por %p87_p5, %p86_p4 }
   0xf   :  { %p89_p7 = pnand %p88_p6, %p82_p3 }
  0x11   :  { %92 = shalt.err (!%p89_p7)
}
  0x12   :  { %19 = dma.hbm_to_vmem [thread:$0]  %s197_s0, 128, %s17_s10, [#allocation3]  }
  0x13   :  { %s93_s25 = scalar_lea.hbm %s198_s1, 128 }
  0x14   :  { %p94_p8 = scmp.ne.s32.totalorder %s198_s1, %s93_s25  ;;  %p97_p9 = scmp.lt.u32.totalorder %s93_s25, %s198_s1 }
  0x16   :  { %p99_p10 = pnand %p97_p9, %p94_p8 }
  0x18   :  { %102 = shalt.err (!%p99_p10)
}
  0x19   :  { %s103_s30 = scalar_lea.vmem %s27_s12, 128  ;;  %p108_p12 = scmp.lt.s32.totalorder %s27_s12, %s27_s12 }
  0x1a   :  { %p104_p11 = scmp.ne.s32.totalorder %s27_s12, %s103_s30  ;;  %p109_p13 = scmp.lt.s32.totalorder %s103_s30, %s103_s30 }
  0x1c   :  { %p110_p0 = por %p109_p13, %p108_p12 }
  0x1e   :  { %p111_p1 = pnand %p110_p0, %p104_p11 }
  0x20   :  { %114 = shalt.err (!%p111_p1)
}
  0x21   :  { %29 = dma.hbm_to_vmem [thread:$0]  %s198_s1, 128, %s27_s12, [#allocation6]  }
  0x22   :  { %137 = dma.done.wait [#allocation3], 128  }
  0x23   :  { %138 = vsyncadd [#allocation3], 4294967168 }
  0x24   :  { %139 = dma.done.wait [#allocation6], 128  }
  0x25   :  { %140 = vsyncadd [#allocation6], 4294967168  ;;  %v36_v0 = vld [vmem:[#allocation2] sm:$0xff]  ;;  %v37_v1 = vld [vmem:[#allocation5] sm:$0xff]  ;;  %s145_s4 = smov [#allocation7]  }
  0x26   :  { %v38_v2 = vmul.f32 -4.0, %v36_v0  ;;  %v41_v3 = vmul.f32 -4.0, %v37_v1  ;;  %s54_s5 = sshll.u32 %s145_s4, 4  ;;  %s55_s5 = int_to_ptr.vmem [resolvable:$true] %s54_s5 }
  0x27   :  { %s115_s1 = scalar_lea.vmem %s55_s5, 128  ;;  %p120_p3 = scmp.lt.s32.totalorder %s55_s5, %s55_s5 }
  0x28   :  { %v39_v4 = vmul.f32 1.442695, %v38_v2  ;;  %v42_v5 = vmul.f32 1.442695, %v41_v3  ;;  %p116_p2 = scmp.ne.s32.totalorder %s55_s5, %s115_s1  ;;  %p121_p4 = scmp.lt.s32.totalorder %s115_s1, %s115_s1 }
  0x2a   :  { %67 = vpow2.f32 %v39_v4  ;;  %p122_p5 = por %p121_p4, %p120_p3 }
  0x2b   :  { %69 = vpow2.f32 %v42_v5 }
  0x2c   :  { %p123_p6 = pnand %p122_p5, %p116_p2 }
  0x34   :  { %v68_v6 = vpop.eup %67 }
  0x35   :  { %v70_v7 = vpop.eup %69 }
  0x36   :  { %v44_v8 = vsub.f32 %v68_v6, %v70_v7 }
  0x38   :  { %v45_v9 = vand.u32 2147483647, %v44_v8 }
  0x3a   :  { %47 = vst [vmem:[#allocation7] sm:$0xff] %v45_v9 }
  0x3b   :  { %126 = shalt.err (!%p123_p6)
}
  0x3c   :  { %s127_s8 = scalar_lea.hbm %s199_s2, 128 }
  0x3d   :  { %p128_p7 = scmp.ne.s32.totalorder %s199_s2, %s127_s8  ;;  %p131_p8 = scmp.lt.u32.totalorder %s127_s8, %s199_s2 }
  0x3f   :  { %p133_p9 = pnand %p131_p8, %p128_p7 }
  0x41   :  { %136 = shalt.err (!%p133_p9)
}
  0x42   :  { %57 = dma.vmem_to_hbm [thread:$0]  %s55_s5, 128, %s199_s2, [#allocation4]  }
  0x43   :  { %141 = dma.done.wait [#allocation4], 128  }
  0x44   :  { %142 = vsyncadd [#allocation4], 4294967168 }
  0x45   :  { %61 = vsyncpa [#allocation3], 1 }
  0x46   :  { %62 = vsyncpa [#allocation6], 1 }
  0x47   :  { %63 = vsyncpa [#allocation4], 1 }

</bundles_post_ra>
